<compile_context>
chip_gen: v7x
topology: tpu7x:2x2x1
jax: 0.10.0
libtpu: 0.0.40
codegen_flags: <defaults>
</compile_context>

<pallas_src>
import functools

import jax
import jax.numpy as jnp
import numpy as np
from jax.experimental import pallas as pl
from jax.experimental.pallas import tpu as pltpu


def _cdiv(a, b):
    return (a + b - 1) // b


def _round_up(x, m):
    return _cdiv(x, m) * m


def _dot(a, b):
    """a @ b -> rank-2 MXU matmul, f32 accumulation (K on a's lane dim)."""
    return jax.lax.dot_general(a, b, (((1,), (0,)), ((), ())),
                               preferred_element_type=jnp.float32)


# ---------------------------------------------------------------------------
# Score kernels
# ---------------------------------------------------------------------------

def _score_and_lse(df, fcg, varg, c2g, fcT, fc2T, out_ref, *, alp, ncls):
    """Shared per-class score + masked log-sum-exp + lane-dense store."""
    ncls_p = fcT.shape[1]
    # TODO(synk): optional, accuracy-gated bf16 inputs for these two matmuls
    # (keeping f32 accumulation) would run the v6e/v7x MXU much closer to peak.
    score = _dot(df - alp * (fcg * varg), fcT) + _dot(varg, fc2T)    # (TB, NCLS_P)
    if ncls_p != ncls:   # keep padded classes out of the log-sum-exp
        cls_iota = jax.lax.broadcasted_iota(jnp.int32, score.shape, 1)
        score = jnp.where(cls_iota < ncls, score, -1e30)
    # class-independent part, added after the (shift-invariant) LSE
    const = c2g - jnp.sum(fcg * df, axis=-1, keepdims=True)          # (TB, 1)
    z = jnp.max(score, axis=-1, keepdims=True)
    lse = jnp.log(jnp.sum(jnp.exp(score - z), axis=-1, keepdims=True) + 1e-6) + z
    res = (lse + const).astype(out_ref.dtype)                        # (TB, 1)
    out_ref[0] = jnp.transpose(res, (1, 0))   # lane-dense (1, TB) unmasked store


def _gaussian_kernel_onehot(gt_ref, df_ref, gather_ref, fcT_ref, fc2T_ref,
                            out_ref, *, alp, ncls, ndf_p):
    """Small-ncls path: gt-row gather done in-kernel with ONE one-hot MXU
    matmul against the lane-concatenated resident [fc | var | c2]."""
    df = df_ref[...]                       # (TB, NDF_P)  f32
    gt = gt_ref[...]                       # (TB, 1)      int32, values in [0, ncls)
    gather_rhs = gather_ref[...]           # (NCLS_P, 2*NDF_P + 128)
    tb, ncls_p = df.shape[0], gather_rhs.shape[0]
    cls_iota = jax.lax.broadcasted_iota(jnp.int32, (tb, ncls_p), 1)
    onehot = (cls_iota == gt).astype(jnp.float32)
    g = _dot(onehot, gather_rhs)                       # (TB, 2*NDF_P + 128)
    fcg = g[:, :ndf_p]                                 # fc[gt]
    varg = g[:, ndf_p:2 * ndf_p]                       # var[gt]
    c2g = g[:, 2 * ndf_p:2 * ndf_p + 1]                # 0.5*alp*<fc[gt]^2, var[gt]>
    _score_and_lse(df, fcg, varg, c2g, fcT_ref[...], fc2T_ref[...], out_ref,
                   alp=alp, ncls=ncls)


def _gaussian_kernel_streamed(df_ref, fcg_ref, varg_ref, c2g_ref, fcT_ref,
                              fc2T_ref, out_ref, *, alp, ncls):
    """Large-ncls path: fc[gt]/var[gt]/c2[gt] pre-gathered in the wrapper and
    streamed as batch tiles (halves the per-step MXU work vs. one-hot)."""
    _score_and_lse(df_ref[...], fcg_ref[...], varg_ref[...], c2g_ref[...],
                   fcT_ref[...], fc2T_ref[...], out_ref, alp=alp, ncls=ncls)


# ---------------------------------------------------------------------------
# Wrapper
# ---------------------------------------------------------------------------

# Whether pipeline_mode=pl.Buffered(1) (single-buffered residents) is usable on
# this jax version; flipped to False after the first lowering failure.
_SINGLE_BUFFER_RESIDENTS = [True]

# One-hot gather adds two (TB x NCLS x NDF) matmuls per step; past a few
# hundred classes it is cheaper to stream pre-gathered fc[gt]/var[gt] tiles.
_STREAM_GATHER_NCLS = 256


def gaussian_score(df, gt, fc, var, alp, tb=512, stream_gather=None):
    """Gaussian corrupted-likelihood score.  Returns (B, 1) float32.

    Precondition: gt must lie in [0, ncls); out-of-range labels gather a
    clipped/zero row instead of raising (unlike torch advanced indexing).
    """
    B, ndf = df.shape
    ncls = fc.shape[0]
    f32 = jnp.float32
    df = df.astype(f32)
    fc = fc.astype(f32)
    var = var.astype(f32)
    gt = gt.astype(jnp.int32)

    if stream_gather is None:
        stream_gather = ncls >= _STREAM_GATHER_NCLS

    ndf_p = _round_up(ndf, 128)     # feature dim: lane-dense
    ncls_p = _round_up(ncls, 8)     # class dim: sublane alignment is enough

    # Batch tiling: near-even split with minimal pad waste, and >= 2 grid
    # steps whenever B allows it so the ("parallel",) axis can be sharded
    # across both TensorCores on v7x.
    nb = max(_cdiv(B, tb), 2 if B >= 16 else 1)
    tb_eff = _round_up(_cdiv(B, nb), 8)
    b_pad = nb * tb_eff

    def pad2(x, rows, cols):
        if x.shape == (rows, cols):        # skip the pad copy when aligned
            return x
        return jnp.zeros((rows, cols), x.dtype).at[:x.shape[0], :x.shape[1]].set(x)

    df_p = pad2(df, b_pad, ndf_p)

    # Residents, pre-transposed so both score matmuls contract naturally
    # (no per-step transpose of the class matrices inside the kernel).
    fcT = pad2(fc, ncls_p, ndf_p).T                              # (NDF_P, NCLS_P)
    fc2T = (0.5 * float(alp)) * fcT * fcT                        # hoisted 0.5*alp*fc^2
    c2 = (0.5 * float(alp)) * jnp.sum(fc * fc * var, axis=-1)    # (ncls,)

    cls_l = _round_up(ncls_p, 128)   # physical lane footprint of the class dim

    if stream_gather:
        fcg_p = pad2(jnp.take(fc, gt, axis=0), b_pad, ndf_p)     # fc[gt]
        varg_p = pad2(jnp.take(var, gt, axis=0), b_pad, ndf_p)   # var[gt]
        c2g_p = pad2(jnp.take(c2, gt, axis=0)[:, None], b_pad, 1)
        args = (df_p, fcg_p, varg_p, c2g_p, fcT, fc2T)
        kernel = functools.partial(_gaussian_kernel_streamed,
                                   alp=float(alp), ncls=ncls)
        stream_specs = [
            pl.BlockSpec((tb_eff, ndf_p), lambda i: (i, 0)),     # df
            pl.BlockSpec((tb_eff, ndf_p), lambda i: (i, 0)),     # fc[gt]
            pl.BlockSpec((tb_eff, ndf_p), lambda i: (i, 0)),     # var[gt]
            pl.BlockSpec((tb_eff, 1), lambda i: (i, 0)),         # c2[gt]
        ]
        resident_shapes = [fcT.shape, fc2T.shape]
        stream_words = 3 * tb_eff * ndf_p + tb_eff * 128
        tmp_words = 2 * tb_eff * ndf_p + 3 * tb_eff * cls_l
    else:
        gw = 2 * ndf_p + 128                 # [ fc | var | c2, zero lane pad ]
        gather_rhs = jnp.zeros((ncls_p, gw), f32)
        gather_rhs = gather_rhs.at[:ncls, :ndf].set(fc)
        gather_rhs = gather_rhs.at[:ncls, ndf_p:ndf_p + ndf].set(var)
        gather_rhs = gather_rhs.at[:ncls, 2 * ndf_p].set(c2)
        gt_p = pad2(gt[:, None], b_pad, 1)
        args = (gt_p, df_p, gather_rhs, fcT, fc2T)
        kernel = functools.partial(_gaussian_kernel_onehot,
                                   alp=float(alp), ncls=ncls, ndf_p=ndf_p)
        stream_specs = [
            pl.BlockSpec((tb_eff, 1), lambda i: (i, 0)),         # gt
            pl.BlockSpec((tb_eff, ndf_p), lambda i: (i, 0)),     # df
        ]
        resident_shapes = [gather_rhs.shape, fcT.shape, fc2T.shape]
        stream_words = tb_eff * ndf_p + tb_eff * 128
        tmp_words = 4 * tb_eff * ndf_p + 4 * tb_eff * cls_l + tb_eff * gw

    resident_words = sum(r * _round_up(c, 128) for (r, c) in resident_shapes)

    def vmem_limit(single_buffer_residents):
        res_bufs = 1 if single_buffer_residents else 2
        est = 4 * (2 * stream_words + res_bufs * resident_words + tmp_words
                   + 2 * 8 * tb_eff)
        # 2x headroom for Mosaic internal scratch; never request all of v7x's
        # 64 MiB physical VMEM.
        return int(min(max(2 * est, 32 << 20), 48 << 20))

    out_spec = pl.BlockSpec((1, 1, tb_eff), lambda i: (i, 0, 0))

    def call(single_buffer_residents):
        res_kw = ({"pipeline_mode": pl.Buffered(1)}
                  if single_buffer_residents else {})
        in_specs = stream_specs + [
            pl.BlockSpec(s, lambda i: (0, 0), **res_kw) for s in resident_shapes]
        return pl.pallas_call(
            kernel,
            out_shape=jax.ShapeDtypeStruct((nb, 1, tb_eff), f32),
            grid_spec=pltpu.PrefetchScalarGridSpec(
                num_scalar_prefetch=0,
                grid=(nb,),
                in_specs=in_specs,
                out_specs=out_spec),
            compiler_params=pltpu.CompilerParams(
                dimension_semantics=("parallel",),
                vmem_limit_bytes=vmem_limit(single_buffer_residents)),
        )(*args)

    # TODO(synk): for very large ncls*ndf (v7x: 64 MiB VMEM) add an inner
    # "arbitrary" class-tile grid axis with online-LSE scratch instead of
    # keeping fcT/fc2T fully resident.
    try:
        out = call(_SINGLE_BUFFER_RESIDENTS[0])
    except Exception:
        if not _SINGLE_BUFFER_RESIDENTS[0]:
            raise
        # pl.Buffered(1) unsupported on this jax version -> default buffering.
        _SINGLE_BUFFER_RESIDENTS[0] = False
        out = call(False)

    return out.reshape(b_pad, 1)[:B]


# ---------------------------------------------------------------------------
# Running-stat update + forward (glue, not the hot path)
# ---------------------------------------------------------------------------

def update_stats(mean, var, counts, df, gt, moving_avg=False,
                 class_conditioned=True):
    # Faithful port of the torch.no_grad() per-sample running-stat update.
    # Inherently sequential, data-dependent scatter with per-class counters ->
    # plain-JAX lax.scan (glue, not a Pallas kernel).
    def body(carry, inp):
        mean, var, counts = carry
        f, t = inp
        if not class_conditioned:
            t = jnp.int32(0)
        it = counts[t].astype(jnp.float32)
        if moving_avg:
            c1, c2 = 0.999, 0.001
        else:
            c1 = it / (it + 1.0)
            c2 = 1.0 / (it + 1.0)
        new_mean_t = jnp.where(it == 0.0, f, mean[t] * c1 + f * c2)
        a = (f - new_mean_t) ** 2
        if moving_avg:
            new_var_t = var[t] * c1 + a * c2
        else:
            new_var_t = var[t] * c1 + a * c1 * c2
        mean = mean.at[t].set(new_mean_t)
        var = var.at[t].set(new_var_t)
        counts = counts.at[t].add(1)
        return (mean, var, counts), None

    (mean, var, counts), _ = jax.lax.scan(body, (mean, var, counts), (df, gt))
    if not class_conditioned:
        mean = jnp.broadcast_to(mean[0:1], mean.shape)
        var = jnp.broadcast_to(var[0:1], var.shape)
    return mean, var, counts


def criterion_diag_forward(state, df, gt, fc, alp=0.1, moving_avg=False,
                           distribution="Gaussian", class_conditioned=True):
    mean, var, counts = state
    mean, var, counts = update_stats(mean, var, counts, df, gt,
                                     moving_avg, class_conditioned)
    if distribution != "Gaussian":
        # TODO(synk): Laplace / Poisson / Blankout score variants not implemented.
        raise NotImplementedError("only the default Gaussian branch is implemented")
    # uses the *updated* var, as in torch (self.var is mutated before scoring)
    score = gaussian_score(df, gt, fc, var, alp)
    return score, (mean, var, counts)


def _ref_score(df, gt, fc, var, alp):
    # pure-JAX reference of the torch Gaussian branch
    fc_gt = fc[gt]
    var_gt = var[gt]
    W = fc[None, :, :] - fc_gt[:, None, :]                          # (B, ncls, ndf)
    s = (jnp.einsum("bcd,bd->bc", W, df)
         + 0.5 * alp * jnp.einsum("bcd,bd->bc", W ** 2, var_gt))    # (B, ncls)
    z = jnp.max(s, axis=1, keepdims=True)
    return jnp.log(jnp.sum(jnp.exp(s - z), axis=1, keepdims=True) + 1e-6) + z


if __name__ == "__main__":
    B, ncls, ndf, alp = 8, 8, 32, 0.1
    key = jax.random.PRNGKey(0)
    k1, k2, k3, k4, k5 = jax.random.split(key, 5)

    df = jax.random.normal(k1, (B, ndf), dtype=jnp.float32)
    gt = jax.random.randint(k2, (B,), 0, ncls, dtype=jnp.int32)
    fc = 0.1 * jax.random.normal(k3, (ncls, ndf), dtype=jnp.float32)

    mean0 = jnp.zeros((ncls, ndf), jnp.float32)   # register_buffer('mean', ...)
    var0 = jnp.zeros((ncls, ndf), jnp.float32)    # register_buffer('var', ...)
    counts0 = jnp.zeros((ncls,), jnp.int32)       # self.it

    score, (mean, var, counts) = criterion_diag_forward(
        (mean0, var0, counts0), df, gt, fc, alp=alp)
    score = jax.block_until_ready(score)
    assert score.shape == (B, 1)
    ref = _ref_score(df, gt, fc, var, alp)
    np.testing.assert_allclose(np.asarray(score), np.asarray(ref),
                               rtol=1e-4, atol=1e-4)

    # multi-step grid + batch padding; exercise both gather paths
    B2 = 20
    df2 = jax.random.normal(k4, (B2, ndf), dtype=jnp.float32)
    gt2 = jax.random.randint(k5, (B2,), 0, ncls, dtype=jnp.int32)
    var2 = jnp.abs(jax.random.normal(k1, (ncls, ndf), dtype=jnp.float32))
    ref2 = _ref_score(df2, gt2, fc, var2, alp)
    for sg in (False, True):
        s2 = jax.block_until_ready(
            gaussian_score(df2, gt2, fc, var2, alp, tb=8, stream_gather=sg))
        np.testing.assert_allclose(np.asarray(s2), np.asarray(ref2),
                                   rtol=1e-4, atol=1e-4)

    # ncls not a multiple of 8 -> exercises the padded-class mask
    ncls3 = 10
    fc3 = 0.1 * jax.random.normal(k3, (ncls3, ndf), dtype=jnp.float32)
    gt3 = jax.random.randint(k5, (B2,), 0, ncls3, dtype=jnp.int32)
    var3 = jnp.abs(jax.random.normal(k2, (ncls3, ndf), dtype=jnp.float32))
    s3 = jax.block_until_ready(gaussian_score(df2, gt3, fc3, var3, alp, tb=16))
    np.testing.assert_allclose(
        np.asarray(s3), np.asarray(_ref_score(df2, gt3, fc3, var3, alp)),
        rtol=1e-4, atol=1e-4)

    print("KERNEL_OK")
</pallas_src>

<mosaic_0001>
module attributes {stable_mosaic.version = 11 : i64} {
  func.func @_gaussian_kernel_onehot(%arg0: i32, %arg1: memref<8x1xi32, #tpu.memory_space<vmem>>, %arg2: memref<8x128xf32, #tpu.memory_space<vmem>>, %arg3: memref<8x384xf32, #tpu.memory_space<vmem>>, %arg4: memref<128x8xf32, #tpu.memory_space<vmem>>, %arg5: memref<128x8xf32, #tpu.memory_space<vmem>>, %arg6: memref<1x1x8xf32, #tpu.memory_space<vmem>>) attributes {dimension_semantics = [#tpu.dimension_semantics<parallel>], iteration_bounds = array<i64: 1>, scalar_prefetch = 0 : i64, scratch_operands = 0 : i64, tpu.core_type = #tpu.core_type<tc>, window_params = [{transform_indices = @transform_0, window_bounds = array<i64: 8, 1>}, {transform_indices = @transform_1, window_bounds = array<i64: 8, 128>}, {pipeline_mode = #tpu.pipeline_mode<synchronous>, transform_indices = @transform_2, window_bounds = array<i64: 8, 384>}, {pipeline_mode = #tpu.pipeline_mode<synchronous>, transform_indices = @transform_3, window_bounds = array<i64: 128, 8>}, {pipeline_mode = #tpu.pipeline_mode<synchronous>, transform_indices = @transform_4, window_bounds = array<i64: 128, 8>}, {transform_indices = @transform_5, window_bounds = array<i64: 1, 1, 8>}]} {
    %c0 = arith.constant 0 : index
    %c0_0 = arith.constant 0 : index
    %0 = vector.load %arg2[%c0, %c0_0] : memref<8x128xf32, #tpu.memory_space<vmem>>, vector<8x128xf32>
    %c0_1 = arith.constant 0 : index
    %c0_2 = arith.constant 0 : index
    %1 = vector.load %arg1[%c0_1, %c0_2] : memref<8x1xi32, #tpu.memory_space<vmem>>, vector<8x1xi32>
    %c0_3 = arith.constant 0 : index
    %c0_4 = arith.constant 0 : index
    %2 = vector.load %arg3[%c0_3, %c0_4] : memref<8x384xf32, #tpu.memory_space<vmem>>, vector<8x384xf32>
    %3 = tpu.iota {dimensions = array<i32: 1>} : vector<8x8xi32>
    %4 = vector.broadcast %1 : vector<8x1xi32> to vector<8x8xi32>
    %5 = arith.cmpi eq, %3, %4 : vector<8x8xi32>
    %6 = arith.extui %5 : vector<8x8xi1> to vector<8x8xi32>
    %7 = arith.sitofp %6 : vector<8x8xi32> to vector<8x8xf32>
    %cst = arith.constant dense<0.000000e+00> : vector<8x384xf32>
    %8 = tpu.matmul %7, %2, %cst {dimension_numbers = #tpu.dot_dimension_numbers<[1], [0], [0], [1], [0, 0, 1, 1], [], []>} : vector<8x8xf32>, vector<8x384xf32>, vector<8x384xf32> -> vector<8x384xf32>
    %9 = vector.extract_strided_slice %8 {offsets = [0, 0], sizes = [8, 128], strides = [1, 1]} : vector<8x384xf32> to vector<8x128xf32>
    %10 = vector.extract_strided_slice %8 {offsets = [0, 128], sizes = [8, 128], strides = [1, 1]} : vector<8x384xf32> to vector<8x128xf32>
    %11 = vector.extract_strided_slice %8 {offsets = [0, 256], sizes = [8, 1], strides = [1, 1]} : vector<8x384xf32> to vector<8x1xf32>
    %c0_5 = arith.constant 0 : index
    %c0_6 = arith.constant 0 : index
    %12 = vector.load %arg4[%c0_5, %c0_6] : memref<128x8xf32, #tpu.memory_space<vmem>>, vector<128x8xf32>
    %c0_7 = arith.constant 0 : index
    %c0_8 = arith.constant 0 : index
    %13 = vector.load %arg5[%c0_7, %c0_8] : memref<128x8xf32, #tpu.memory_space<vmem>>, vector<128x8xf32>
    %14 = arith.mulf %9, %10 : vector<8x128xf32>
    %cst_9 = arith.constant 1.000000e-01 : f32
    %15 = vector.broadcast %cst_9 : f32 to vector<8x128xf32>
    %16 = arith.mulf %15, %14 : vector<8x128xf32>
    %17 = arith.subf %0, %16 : vector<8x128xf32>
    %cst_10 = arith.constant dense<0.000000e+00> : vector<8x8xf32>
    %18 = tpu.matmul %17, %12, %cst_10 {dimension_numbers = #tpu.dot_dimension_numbers<[1], [0], [0], [1], [0, 0, 1, 1], [], []>} : vector<8x128xf32>, vector<128x8xf32>, vector<8x8xf32> -> vector<8x8xf32>
    %cst_11 = arith.constant dense<0.000000e+00> : vector<8x8xf32>
    %19 = tpu.matmul %10, %13, %cst_11 {dimension_numbers = #tpu.dot_dimension_numbers<[1], [0], [0], [1], [0, 0, 1, 1], [], []>} : vector<8x128xf32>, vector<128x8xf32>, vector<8x8xf32> -> vector<8x8xf32>
    %20 = arith.addf %18, %19 : vector<8x8xf32>
    %21 = arith.mulf %9, %0 : vector<8x128xf32>
    %cst_12 = arith.constant dense<0.000000e+00> : vector<8xf32>
    %22 = vector.multi_reduction <add>, %21, %cst_12 [1] : vector<8x128xf32> to vector<8xf32>
    %23 = vector.shape_cast %22 : vector<8xf32> to vector<8x1xf32>
    %24 = arith.subf %11, %23 : vector<8x1xf32>
    %cst_13 = arith.constant dense<0xFF800000> : vector<8xf32>
    %25 = vector.multi_reduction <maximumf>, %20, %cst_13 [1] : vector<8x8xf32> to vector<8xf32>
    %26 = vector.shape_cast %25 : vector<8xf32> to vector<8x1xf32>
    %27 = vector.broadcast %26 : vector<8x1xf32> to vector<8x8xf32>
    %28 = arith.subf %20, %27 : vector<8x8xf32>
    %29 = math.exp %28 : vector<8x8xf32>
    %cst_14 = arith.constant dense<0.000000e+00> : vector<8xf32>
    %30 = vector.multi_reduction <add>, %29, %cst_14 [1] : vector<8x8xf32> to vector<8xf32>
    %31 = vector.shape_cast %30 : vector<8xf32> to vector<8x1xf32>
    %cst_15 = arith.constant 9.99999997E-7 : f32
    %32 = vector.broadcast %cst_15 : f32 to vector<8x1xf32>
    %33 = arith.addf %31, %32 : vector<8x1xf32>
    %34 = math.log %33 : vector<8x1xf32>
    %35 = arith.addf %34, %26 : vector<8x1xf32>
    %36 = arith.addf %35, %24 : vector<8x1xf32>
    %37 = tpu.transpose %36, [1, 0] : vector<8x1xf32> -> vector<1x8xf32>
    %c0_16 = arith.constant 0 : index
    %c0_17 = arith.constant 0 : index
    %c0_18 = arith.constant 0 : index
    %38 = vector.load %arg6[%c0_16, %c0_17, %c0_18] : memref<1x1x8xf32, #tpu.memory_space<vmem>>, vector<1x1x8xf32>
    %39 = vector.shape_cast %38 : vector<1x1x8xf32> to vector<1x8xf32>
    %40 = vector.shape_cast %37 : vector<1x8xf32> to vector<1x1x8xf32>
    tpu.vector_store %arg6[%c0_16, %c0_17, %c0_18], %40 {strides = array<i32>} : memref<1x1x8xf32, #tpu.memory_space<vmem>>, vector<1x1x8xf32>,
    return
  }
  func.func @transform_0(%arg0: i32) -> (i32, i32) {
    %c0_i32 = arith.constant 0 : i32
    %c0_i32_0 = arith.constant 0 : i32
    return %arg0, %c0_i32 : i32, i32
  }
  func.func @transform_1(%arg0: i32) -> (i32, i32) {
    %c0_i32 = arith.constant 0 : i32
    %c0_i32_0 = arith.constant 0 : i32
    return %arg0, %c0_i32 : i32, i32
  }
  func.func @transform_2(%arg0: i32) -> (i32, i32) {
    %c0_i32 = arith.constant 0 : i32
    %c0_i32_0 = arith.constant 0 : i32
    %c0_i32_1 = arith.constant 0 : i32
    return %c0_i32, %c0_i32_0 : i32, i32
  }
  func.func @transform_3(%arg0: i32) -> (i32, i32) {
    %c0_i32 = arith.constant 0 : i32
    %c0_i32_0 = arith.constant 0 : i32
    %c0_i32_1 = arith.constant 0 : i32
    return %c0_i32, %c0_i32_0 : i32, i32
  }
  func.func @transform_4(%arg0: i32) -> (i32, i32) {
    %c0_i32 = arith.constant 0 : i32
    %c0_i32_0 = arith.constant 0 : i32
    %c0_i32_1 = arith.constant 0 : i32
    return %c0_i32, %c0_i32_0 : i32, i32
  }
  func.func @transform_5(%arg0: i32) -> (i32, i32, i32) {
    %c0_i32 = arith.constant 0 : i32
    %c0_i32_0 = arith.constant 0 : i32
    %c0_i32_1 = arith.constant 0 : i32
    return %arg0, %c0_i32, %c0_i32_0 : i32, i32, i32
  }
}

module attributes {stable_mosaic.version = 11 : i64} {
  func.func @_gaussian_kernel_onehot(%arg0: i32, %arg1: memref<8x1xi32, #tpu.memory_space<vmem>>, %arg2: memref<8x128xf32, #tpu.memory_space<vmem>>, %arg3: memref<8x384xf32, #tpu.memory_space<vmem>>, %arg4: memref<128x8xf32, #tpu.memory_space<vmem>>, %arg5: memref<128x8xf32, #tpu.memory_space<vmem>>, %arg6: memref<1x1x8xf32, #tpu.memory_space<vmem>>) attributes {dimension_semantics = [#tpu.dimension_semantics<parallel>], iteration_bounds = array<i64: 1>, scalar_prefetch = 0 : i64, scratch_operands = 0 : i64, tpu.core_type = #tpu.core_type<tc>, window_params = [{transform_indices = @transform_0, window_bounds = array<i64: 8, 1>}, {transform_indices = @transform_1, window_bounds = array<i64: 8, 128>}, {pipeline_mode = #tpu.pipeline_mode<synchronous>, transform_indices = @transform_2, window_bounds = array<i64: 8, 384>}, {pipeline_mode = #tpu.pipeline_mode<synchronous>, transform_indices = @transform_3, window_bounds = array<i64: 128, 8>}, {pipeline_mode = #tpu.pipeline_mode<synchronous>, transform_indices = @transform_4, window_bounds = array<i64: 128, 8>}, {transform_indices = @transform_5, window_bounds = array<i64: 1, 1, 8>}]} {
    %c0 = arith.constant 0 : index
    %c0_0 = arith.constant 0 : index
    %0 = vector.load %arg2[%c0, %c0_0] : memref<8x128xf32, #tpu.memory_space<vmem>>, vector<8x128xf32>
    %c0_1 = arith.constant 0 : index
    %c0_2 = arith.constant 0 : index
    %1 = vector.load %arg1[%c0_1, %c0_2] : memref<8x1xi32, #tpu.memory_space<vmem>>, vector<8x1xi32>
    %c0_3 = arith.constant 0 : index
    %c0_4 = arith.constant 0 : index
    %2 = vector.load %arg3[%c0_3, %c0_4] : memref<8x384xf32, #tpu.memory_space<vmem>>, vector<8x384xf32>
    %3 = tpu.iota {dimensions = array<i32: 1>} : vector<8x8xi32>
    %4 = vector.broadcast %1 : vector<8x1xi32> to vector<8x8xi32>
    %5 = arith.cmpi eq, %3, %4 : vector<8x8xi32>
    %6 = arith.extui %5 : vector<8x8xi1> to vector<8x8xi32>
    %7 = arith.sitofp %6 : vector<8x8xi32> to vector<8x8xf32>
    %cst = arith.constant dense<0.000000e+00> : vector<8x384xf32>
    %8 = tpu.matmul %7, %2, %cst {dimension_numbers = #tpu.dot_dimension_numbers<[1], [0], [0], [1], [0, 0, 1, 1], [], []>} : vector<8x8xf32>, vector<8x384xf32>, vector<8x384xf32> -> vector<8x384xf32>
    %9 = vector.extract_strided_slice %8 {offsets = [0, 0], sizes = [8, 128], strides = [1, 1]} : vector<8x384xf32> to vector<8x128xf32>
    %10 = vector.extract_strided_slice %8 {offsets = [0, 128], sizes = [8, 128], strides = [1, 1]} : vector<8x384xf32> to vector<8x128xf32>
    %11 = vector.extract_strided_slice %8 {offsets = [0, 256], sizes = [8, 1], strides = [1, 1]} : vector<8x384xf32> to vector<8x1xf32>
    %c0_5 = arith.constant 0 : index
    %c0_6 = arith.constant 0 : index
    %12 = vector.load %arg4[%c0_5, %c0_6] : memref<128x8xf32, #tpu.memory_space<vmem>>, vector<128x8xf32>
    %c0_7 = arith.constant 0 : index
    %c0_8 = arith.constant 0 : index
    %13 = vector.load %arg5[%c0_7, %c0_8] : memref<128x8xf32, #tpu.memory_space<vmem>>, vector<128x8xf32>
    %14 = arith.mulf %9, %10 : vector<8x128xf32>
    %cst_9 = arith.constant 1.000000e-01 : f32
    %15 = vector.broadcast %cst_9 : f32 to vector<8x128xf32>
    %16 = arith.mulf %15, %14 : vector<8x128xf32>
    %17 = arith.subf %0, %16 : vector<8x128xf32>
    %cst_10 = arith.constant dense<0.000000e+00> : vector<8x8xf32>
    %18 = tpu.matmul %17, %12, %cst_10 {dimension_numbers = #tpu.dot_dimension_numbers<[1], [0], [0], [1], [0, 0, 1, 1], [], []>} : vector<8x128xf32>, vector<128x8xf32>, vector<8x8xf32> -> vector<8x8xf32>
    %cst_11 = arith.constant dense<0.000000e+00> : vector<8x8xf32>
    %19 = tpu.matmul %10, %13, %cst_11 {dimension_numbers = #tpu.dot_dimension_numbers<[1], [0], [0], [1], [0, 0, 1, 1], [], []>} : vector<8x128xf32>, vector<128x8xf32>, vector<8x8xf32> -> vector<8x8xf32>
    %20 = arith.addf %18, %19 : vector<8x8xf32>
    %21 = arith.mulf %9, %0 : vector<8x128xf32>
    %cst_12 = arith.constant dense<0.000000e+00> : vector<8xf32>
    %22 = vector.multi_reduction <add>, %21, %cst_12 [1] : vector<8x128xf32> to vector<8xf32>
    %23 = vector.shape_cast %22 : vector<8xf32> to vector<8x1xf32>
    %24 = arith.subf %11, %23 : vector<8x1xf32>
    %cst_13 = arith.constant dense<0xFF800000> : vector<8xf32>
    %25 = vector.multi_reduction <maximumf>, %20, %cst_13 [1] : vector<8x8xf32> to vector<8xf32>
    %26 = vector.shape_cast %25 : vector<8xf32> to vector<8x1xf32>
    %27 = vector.broadcast %26 : vector<8x1xf32> to vector<8x8xf32>
    %28 = arith.subf %20, %27 : vector<8x8xf32>
    %29 = math.exp %28 : vector<8x8xf32>
    %cst_14 = arith.constant dense<0.000000e+00> : vector<8xf32>
    %30 = vector.multi_reduction <add>, %29, %cst_14 [1] : vector<8x8xf32> to vector<8xf32>
    %31 = vector.shape_cast %30 : vector<8xf32> to vector<8x1xf32>
    %cst_15 = arith.constant 9.99999997E-7 : f32
    %32 = vector.broadcast %cst_15 : f32 to vector<8x1xf32>
    %33 = arith.addf %31, %32 : vector<8x1xf32>
    %34 = math.log %33 : vector<8x1xf32>
    %35 = arith.addf %34, %26 : vector<8x1xf32>
    %36 = arith.addf %35, %24 : vector<8x1xf32>
    %37 = tpu.transpose %36, [1, 0] : vector<8x1xf32> -> vector<1x8xf32>
    %c0_16 = arith.constant 0 : index
    %c0_17 = arith.constant 0 : index
    %c0_18 = arith.constant 0 : index
    %38 = vector.load %arg6[%c0_16, %c0_17, %c0_18] : memref<1x1x8xf32, #tpu.memory_space<vmem>>, vector<1x1x8xf32>
    %39 = vector.shape_cast %38 : vector<1x1x8xf32> to vector<1x8xf32>
    %40 = vector.shape_cast %37 : vector<1x8xf32> to vector<1x1x8xf32>
    tpu.vector_store %arg6[%c0_16, %c0_17, %c0_18], %40 {strides = array<i32>} : memref<1x1x8xf32, #tpu.memory_space<vmem>>, vector<1x1x8xf32>,
    return
  }
  func.func @transform_0(%arg0: i32) -> (i32, i32) {
    %c0_i32 = arith.constant 0 : i32
    %c0_i32_0 = arith.constant 0 : i32
    return %arg0, %c0_i32 : i32, i32
  }
  func.func @transform_1(%arg0: i32) -> (i32, i32) {
    %c0_i32 = arith.constant 0 : i32
    %c0_i32_0 = arith.constant 0 : i32
    return %arg0, %c0_i32 : i32, i32
  }
  func.func @transform_2(%arg0: i32) -> (i32, i32) {
    %c0_i32 = arith.constant 0 : i32
    %c0_i32_0 = arith.constant 0 : i32
    %c0_i32_1 = arith.constant 0 : i32
    return %c0_i32, %c0_i32_0 : i32, i32
  }
  func.func @transform_3(%arg0: i32) -> (i32, i32) {
    %c0_i32 = arith.constant 0 : i32
    %c0_i32_0 = arith.constant 0 : i32
    %c0_i32_1 = arith.constant 0 : i32
    return %c0_i32, %c0_i32_0 : i32, i32
  }
  func.func @transform_4(%arg0: i32) -> (i32, i32) {
    %c0_i32 = arith.constant 0 : i32
    %c0_i32_0 = arith.constant 0 : i32
    %c0_i32_1 = arith.constant 0 : i32
    return %c0_i32, %c0_i32_0 : i32, i32
  }
  func.func @transform_5(%arg0: i32) -> (i32, i32, i32) {
    %c0_i32 = arith.constant 0 : i32
    %c0_i32_0 = arith.constant 0 : i32
    %c0_i32_1 = arith.constant 0 : i32
    return %arg0, %c0_i32, %c0_i32_0 : i32, i32, i32
  }
}

</mosaic_0001>

<bundles_post_ra>
// kernel: tpu_custom_call.1
= control target key start
LH: loop header
LB: loop body
LE: loop exit
PB: predicated region body
PF: predicated region fallthrough
CT: control target
= control target key end

     0   :  { %s798_s0 = inlined_call_operand.vmem [shape: s32[8,1], index: 0, kind: input, shape index: {}]   ;;  %s799_s1 = inlined_call_operand.vmem [shape: f32[8,128], index: 1, kind: input, shape index: {}]   ;;  %s800_s2 = inlined_call_operand.vmem [shape: f32[8,384], index: 2, kind: input, shape index: {}]   ;;  %s801_s3 = inlined_call_operand.vmem [shape: f32[128,8], index: 3, kind: input, shape index: {}]   ;;  %s802_s4 = inlined_call_operand.vmem [shape: f32[128,8], index: 4, kind: input, shape index: {}]   ;;  %s803_s5 = inlined_call_operand.hbm [shape: f32[1,1,8], index: 5, kind: output, shape index: {}]  }
   0x1   :  { %v22_v0 = vld [vmem:[%s798_s0] sm:$0xff] }
   0x2   :  { %10 = vsyncpa [#allocation3], 0  ;;  %v617_v1 = vmov 0   ;;  %v24_v2 = vld [vmem:[%s800_s2 + $0x8] sm:$0xff]  ;;  %v618_v3 = vmov 0.0   ;;  %v23_v4 = vld [vmem:[%s800_s2] sm:$0xff]  ;;  %v26_v7 = vlaneseq }
   0x3   :  { %588 = vset.pattern.permute.xlu0 %v617_v1  ;;  %459 = vmatprep.subr.mxu1 %v618_v3  ;;  %v25_v5 = vld [vmem:[%s800_s2 + $0x10] sm:$0xff]  ;;  %vm619_vm0 = vmmov 0   ;;  %v620_v6 = vmov 0.0|0.0   ;;  %v195_v8 = vld [vmem:[%s802_s4] sm:$0xff]  ;;  %v196_v10 = vld [vmem:[%s802_s4 + $0x8] sm:$0xff]  ;;  %vm34_vm1 = vcmask 64512  }
   0x4   :  { %29 = vperm.xlu0 %588, %v22_v0   ;;  %38 = vmatprep.subr.mxu0 %v24_v2  ;;  %v27_v9 = vand.u32 127, %v26_v7  ;;  %v179_v11 = vld [vmem:[%s801_s3] sm:$0xff]  ;;  %v180_v12 = vld [vmem:[%s801_s3 + $0x8] sm:$0xff]  ;;  %v535_v14 = vpack.c.bf16 %v196_v10, %v195_v8  ;;  %v197_v15 = vld [vmem:[%s802_s4 + $0x10] sm:$0xff]  ;;  %vm404_vm3 = vcmask 57344  }
   0x5   :  { %39 = vmatpush1.msra.mxu0 %v23_v4  ;;  %102 = vmatprep.mubr.f32.mxu0 %v618_v3  ;;  %v559_v16 = vpack.c.bf16 %v180_v12, %v179_v11  ;;  %v198_v17 = vld [vmem:[%s802_s4 + $0x18] sm:$0xff]  ;;  %v181_v18 = vld [vmem:[%s801_s3 + $0x10] sm:$0xff]  ;;  %v199_v22 = vld [vmem:[%s802_s4 + $0x20] sm:$0xff] }
   0x6   :  { %460 = vmatpush3.msra.mxu1 %v25_v5  ;;  %461 = vmatprep.mubr.msk.f32.mxu1 %vm619_vm0, %v618_v3  ;;  %v182_v19 = vld [vmem:[%s801_s3 + $0x18] sm:$0xff]  ;;  %v538_v21 = vpack.c.bf16 %v198_v17, %v197_v15  ;;  %v200_v24 = vld [vmem:[%s802_s4 + $0x28] sm:$0xff]  ;;  %v183_v25 = vld [vmem:[%s801_s3 + $0x20] sm:$0xff] }
   0x7   :  { %534 = vmatprep.subr.bf16.mxu1 %v620_v6  ;;  %558 = vmatprep.subr.bf16.mxu0 %v620_v6  ;;  %v562_v23 = vpack.c.bf16 %v182_v19, %v181_v18  ;;  %v184_v26 = vld [vmem:[%s801_s3 + $0x28] sm:$0xff]  ;;  %v541_v27 = vpack.c.bf16 %v200_v24, %v199_v22  ;;  %v201_v28 = vld [vmem:[%s802_s4 + $0x30] sm:$0xff]  ;;  %v202_v30 = vld [vmem:[%s802_s4 + $0x38] sm:$0xff] }
   0x8   :  { %v565_v29 = vpack.c.bf16 %v184_v26, %v183_v25  ;;  %v185_v31 = vld [vmem:[%s801_s3 + $0x30] sm:$0xff]  ;;  %v186_v32 = vld [vmem:[%s801_s3 + $0x38] sm:$0xff]  ;;  %v544_v33 = vpack.c.bf16 %v202_v30, %v201_v28  ;;  %v203_v34 = vld [vmem:[%s802_s4 + $0x40] sm:$0xff] }
   0x9   :  { %v568_v35 = vpack.c.bf16 %v186_v32, %v185_v31  ;;  %v204_v36 = vld [vmem:[%s802_s4 + $0x48] sm:$0xff]  ;;  %v187_v37 = vld [vmem:[%s801_s3 + $0x40] sm:$0xff]  ;;  %v205_v40 = vld [vmem:[%s802_s4 + $0x50] sm:$0xff] }
   0xa   :  { %v188_v38 = vld [vmem:[%s801_s3 + $0x48] sm:$0xff]  ;;  %v547_v39 = vpack.c.bf16 %v204_v36, %v203_v34  ;;  %v206_v42 = vld [vmem:[%s802_s4 + $0x58] sm:$0xff]  ;;  %v189_v43 = vld [vmem:[%s801_s3 + $0x50] sm:$0xff] }
   0xb   :  { %v571_v41 = vpack.c.bf16 %v188_v38, %v187_v37  ;;  %v190_v44 = vld [vmem:[%s801_s3 + $0x58] sm:$0xff]  ;;  %v550_v45 = vpack.c.bf16 %v206_v42, %v205_v40  ;;  %v207_v47 = vld [vmem:[%s802_s4 + $0x60] sm:$0xff]  ;;  %v208_v48 = vld [vmem:[%s802_s4 + $0x68] sm:$0xff] }
   0xc   :  { %v574_v46 = vpack.c.bf16 %v190_v44, %v189_v43  ;;  %v553_v49 = vpack.c.bf16 %v208_v48, %v207_v47  ;;  %v209_v50 = vld [vmem:[%s802_s4 + $0x70] sm:$0xff]  ;;  %v210_v51 = vld [vmem:[%s802_s4 + $0x78] sm:$0xff]  ;;  %v191_v53 = vld [vmem:[%s801_s3 + $0x60] sm:$0xff] }
   0xd   :  { %v556_v52 = vpack.c.bf16 %v210_v51, %v209_v50  ;;  %v192_v54 = vld [vmem:[%s801_s3 + $0x68] sm:$0xff]  ;;  %v193_v56 = vld [vmem:[%s801_s3 + $0x70] sm:$0xff]  ;;  %v194_v57 = vld [vmem:[%s801_s3 + $0x78] sm:$0xff] }
   0xe   :  { %v577_v55 = vpack.c.bf16 %v192_v54, %v191_v53  ;;  %v580_v58 = vpack.c.bf16 %v194_v57, %v193_v56  ;;  %v21_v59 = vld [vmem:[%s799_s1] sm:$0xff]  ;;  %s621_s1 = smov [#allocation2]  }
   0xf   :  { %s412_s3 = sshll.u32 %s621_s1, 4  ;;  %s413_s3 = int_to_ptr.vmem [resolvable:$true] %s412_s3 }
  0x10   :  { %s593_s10 = scalar_lea.vmem %s413_s3, 16  ;;  %s597_s11 = scalar_lea.vmem %s413_s3, 32 }
  0x11   :  { %p594_p0 = scmp.ne.s32.totalorder %s413_s3, %s593_s10  ;;  %p598_p1 = scmp.lt.s32.totalorder %s413_s3, %s413_s3 }
  0x12   :  { %p599_p2 = scmp.lt.s32.totalorder %s597_s11, %s593_s10 }
  0x14   :  { %p600_p3 = por %p599_p2, %p598_p1 }
  0x16   :  { %p601_p4 = pnand %p600_p3, %p594_p0 }
  0x83   :  { %v30_v13 = vpop.permute.xlu0 %29 }
  0x84   :  { %vm31_vm2 = vcmp.eq.s32.totalorder %v27_v9, %v30_v13 }
  0x85   :  { %v420_v20 = vsel %vm31_vm2, 1.0, %v618_v3 }
  0x86   :  { %421 = vmatmul.mubr.msk.f32.vlgmr.msra.gmra.mrb[0].mxu0 %vm34_vm1, %v420_v20  ;;  %462 = vmatmul.mubr.msk.f32.vlgmr.msra.gmra.mrb[0].mxu1 %vm34_vm1, %v420_v20 }
  0x87   :  { %536 = vmatpush3.bf16.msra.mxu1 %v535_v14  ;;  %560 = vmatpush3.bf16.msra.mxu0 %v559_v16 }
  0x88   :  { %537 = vmatprep.subr.bf16.mxu1 %v620_v6  ;;  %561 = vmatprep.subr.bf16.mxu0 %v620_v6 }
  0x89   :  { %496 = vmatprep.mubr.msk.f32.mxu1 %vm619_vm0, %v618_v3  ;;  %531 = vmatprep.mubr.msk.f32.mxu0 %vm619_vm0, %v618_v3 }
  0x8b   :  { %539 = vmatpush3.bf16.msra.mxu1 %v538_v21  ;;  %563 = vmatpush3.bf16.msra.mxu0 %v562_v23 }
  0x8c   :  { %540 = vmatprep.subr.bf16.mxu1 %v620_v6  ;;  %564 = vmatprep.subr.bf16.mxu0 %v620_v6 }
  0x8f   :  { %542 = vmatpush3.bf16.msra.mxu1 %v541_v27  ;;  %566 = vmatpush3.bf16.msra.mxu0 %v565_v29 }
  0x90   :  { %543 = vmatprep.subr.bf16.mxu1 %v620_v6  ;;  %567 = vmatprep.subr.bf16.mxu0 %v620_v6 }
  0x93   :  { %545 = vmatpush3.bf16.msra.mxu1 %v544_v33  ;;  %569 = vmatpush3.bf16.msra.mxu0 %v568_v35 }
  0x94   :  { %546 = vmatprep.subr.bf16.mxu1 %v620_v6  ;;  %570 = vmatprep.subr.bf16.mxu0 %v620_v6 }
  0x97   :  { %548 = vmatpush3.bf16.msra.mxu1 %v547_v39  ;;  %572 = vmatpush3.bf16.msra.mxu0 %v571_v41 }
  0x98   :  { %549 = vmatprep.subr.bf16.mxu1 %v620_v6  ;;  %573 = vmatprep.subr.bf16.mxu0 %v620_v6 }
  0x9b   :  { %551 = vmatpush3.bf16.msra.mxu1 %v550_v45  ;;  %575 = vmatpush3.bf16.msra.mxu0 %v574_v46 }
  0x9c   :  { %552 = vmatprep.subr.bf16.mxu1 %v620_v6  ;;  %576 = vmatprep.subr.bf16.mxu0 %v620_v6 }
  0x9f   :  { %554 = vmatpush3.bf16.msra.mxu1 %v553_v49  ;;  %578 = vmatpush3.bf16.msra.mxu0 %v577_v55 }
  0xa0   :  { %555 = vmatprep.subr.bf16.mxu1 %v620_v6  ;;  %579 = vmatprep.subr.bf16.mxu0 %v620_v6 }
  0xa3   :  { %557 = vmatpush3.bf16.msra.mxu1 %v556_v52  ;;  %581 = vmatpush3.bf16.msra.mxu0 %v580_v58 }
 0x159   :  { %v104_v60 = vpop.f32.mrb[0].mxu0  ;;  %v175_v61 = vpop.f32.mrb[0].mxu1 }
 0x15a   :  { %v106_v62 = vpop.f32.mrb[1].mxu0  ;;  %v463_v63 = vpop.f32.mrb[1].mxu1  ;;  %v354_v0 = vmul.f32 %v104_v60, %v21_v59 }
 0x15b   :  { %v211_v1 = vmul.f32 %v106_v62, %v104_v60  ;;  %497 = vmatmul.mubr.f32.vlgmr.msra.gmra.mrb[2].mxu1 %v106_v62 }
 0x15d   :  { %v212_v2 = vmul.f32 0.1, %v211_v1 }
 0x15f   :  { %v213_v3 = vsub.f32 %v21_v59, %v212_v2 }
 0x161   :  { %532 = vmatmul.mubr.f32.vlgmr.msra.gmra.mrb[2].mxu0 %v213_v3 }
 0x22e   :  { %v280_v4 = vpop.f32.mrb[2].mxu1 }
 0x22f   :  { %v498_v5 = vpop.f32.mrb[3].mxu1 }
 0x234   :  { %v350_v6 = vpop.f32.mrb[2].mxu0 }
 0x235   :  { %v351_v7 = vadd.f32 %v350_v6, %v280_v4  ;;  %v533_v8 = vpop.f32.mrb[3].mxu0 }
 0x237   :  { %v358_v9 = vsel %vm34_vm1, %v351_v7, -inf }
 0x238   :  { %359 = vmax.xlane.f32.xlu0 %v358_v9 }
 0x2c5   :  { %v360_v10 = vpop.xlane.xlu0 %359 }
 0x2c6   :  { %v361_v11 = vsub.f32 %v351_v7, %v360_v10 }
 0x2c8   :  { %v362_v12 = vmul.f32 1.442695, %v361_v11 }
 0x2ca   :  { %589 = vpow2.f32 %v362_v12 }
 0x2d4   :  { %v590_v13 = vpop.eup %589 }
 0x2d5   :  { %v364_v14 = vsel %vm34_vm1, %v590_v13, 0.0 }
 0x2d6   :  { %365 = vadd.xlane.f32.xlu1 %v364_v14 }
 0x2da   :  { %355 = vadd.xlane.f32.xlu1 %v354_v0 }
 0x363   :  { %v366_v15 = vpop.xlane.xlu1 %365 }
 0x364   :  { %v367_v16 = vadd.f32 1e-06, %v366_v15 }
 0x366   :  { %591 = vlog2.f32 %v367_v16 }
 0x367   :  { %v356_v18 = vpop.xlane.xlu1 %355 }
 0x368   :  { %v357_v20 = vsub.f32 %v175_v61, %v356_v18 }
 0x370   :  { %v592_v17 = vpop.eup %591 }
 0x371   :  { %v369_v19 = vmul.f32 0.6931472, %v592_v17 }
 0x373   :  { %v370_v21 = vadd.f32 %v369_v19, %v360_v10 }
 0x375   :  { %v371_v22 = vadd.f32 %v370_v21, %v357_v20 }
 0x377   :  { %372 = vxpose.xlu1.b32.start.end [1/1] (short) (narrow) %v371_v22, 8 }
 0x3f7   :  { %v388_v23 = vpop.trf.xlu1 }
 0x3f8   :  { %405 = vst.msk [vmem:[#allocation2] sm:$0x1] %vm404_vm3, %v388_v23 }
 0x3f9   :  { %604 = shalt.err (!%p601_p4)
}
 0x3fa   :  { %s605_s14 = scalar_lea.hbm %s803_s5, 16 }
 0x3fb   :  { %p606_p5 = scmp.ne.s32.totalorder %s803_s5, %s605_s14  ;;  %p609_p6 = scmp.lt.u32.totalorder %s605_s14, %s803_s5 }
 0x3fd   :  { %p611_p7 = pnand %p609_p6, %p606_p5 }
 0x3ff   :  { %614 = shalt.err (!%p611_p7)
}
 0x400   :  { %415 = dma.vmem_to_hbm [thread:$0]  %s413_s3, 16, %s803_s5, [#allocation3]  }
 0x401   :  { %615 = dma.done.wait [#allocation3], 16  }
 0x402   :  { %616 = vsyncadd [#allocation3], 4294967280 }
 0x403   :  { %419 = vsyncpa [#allocation3], 1 }

// kernel: tpu_custom_call.1
= control target key start
LH: loop header
LB: loop body
LE: loop exit
PB: predicated region body
PF: predicated region fallthrough
CT: control target
= control target key end

     0   :  { %s798_s0 = inlined_call_operand.vmem [shape: s32[8,1], index: 0, kind: input, shape index: {}]   ;;  %s799_s1 = inlined_call_operand.vmem [shape: f32[8,128], index: 1, kind: input, shape index: {}]   ;;  %s800_s2 = inlined_call_operand.vmem [shape: f32[8,384], index: 2, kind: input, shape index: {}]   ;;  %s801_s3 = inlined_call_operand.vmem [shape: f32[128,8], index: 3, kind: input, shape index: {}]   ;;  %s802_s4 = inlined_call_operand.vmem [shape: f32[128,8], index: 4, kind: input, shape index: {}]   ;;  %s803_s5 = inlined_call_operand.hbm [shape: f32[1,1,8], index: 5, kind: output, shape index: {}]  }
   0x1   :  { %v22_v0 = vld [vmem:[%s798_s0] sm:$0xff] }
   0x2   :  { %10 = vsyncpa [#allocation3], 0  ;;  %v617_v1 = vmov 0   ;;  %v24_v2 = vld [vmem:[%s800_s2 + $0x8] sm:$0xff]  ;;  %v618_v3 = vmov 0.0   ;;  %v23_v4 = vld [vmem:[%s800_s2] sm:$0xff]  ;;  %v26_v7 = vlaneseq }
   0x3   :  { %588 = vset.pattern.permute.xlu0 %v617_v1  ;;  %459 = vmatprep.subr.mxu1 %v618_v3  ;;  %v25_v5 = vld [vmem:[%s800_s2 + $0x10] sm:$0xff]  ;;  %vm619_vm0 = vmmov 0   ;;  %v620_v6 = vmov 0.0|0.0   ;;  %v195_v8 = vld [vmem:[%s802_s4] sm:$0xff]  ;;  %v196_v10 = vld [vmem:[%s802_s4 + $0x8] sm:$0xff]  ;;  %vm34_vm1 = vcmask 64512  }
   0x4   :  { %29 = vperm.xlu0 %588, %v22_v0   ;;  %38 = vmatprep.subr.mxu0 %v24_v2  ;;  %v27_v9 = vand.u32 127, %v26_v7  ;;  %v179_v11 = vld [vmem:[%s801_s3] sm:$0xff]  ;;  %v180_v12 = vld [vmem:[%s801_s3 + $0x8] sm:$0xff]  ;;  %v535_v14 = vpack.c.bf16 %v196_v10, %v195_v8  ;;  %v197_v15 = vld [vmem:[%s802_s4 + $0x10] sm:$0xff]  ;;  %vm404_vm3 = vcmask 57344  }
   0x5   :  { %39 = vmatpush1.msra.mxu0 %v23_v4  ;;  %102 = vmatprep.mubr.f32.mxu0 %v618_v3  ;;  %v559_v16 = vpack.c.bf16 %v180_v12, %v179_v11  ;;  %v198_v17 = vld [vmem:[%s802_s4 + $0x18] sm:$0xff]  ;;  %v181_v18 = vld [vmem:[%s801_s3 + $0x10] sm:$0xff]  ;;  %v199_v22 = vld [vmem:[%s802_s4 + $0x20] sm:$0xff] }
   0x6   :  { %460 = vmatpush3.msra.mxu1 %v25_v5  ;;  %461 = vmatprep.mubr.msk.f32.mxu1 %vm619_vm0, %v618_v3  ;;  %v182_v19 = vld [vmem:[%s801_s3 + $0x18] sm:$0xff]  ;;  %v538_v21 = vpack.c.bf16 %v198_v17, %v197_v15  ;;  %v200_v24 = vld [vmem:[%s802_s4 + $0x28] sm:$0xff]  ;;  %v183_v25 = vld [vmem:[%s801_s3 + $0x20] sm:$0xff] }
   0x7   :  { %534 = vmatprep.subr.bf16.mxu1 %v620_v6  ;;  %558 = vmatprep.subr.bf16.mxu0 %v620_v6  ;;  %v562_v23 = vpack.c.bf16 %v182_v19, %v181_v18  ;;  %v184_v26 = vld [vmem:[%s801_s3 + $0x28] sm:$0xff]  ;;  %v541_v27 = vpack.c.bf16 %v200_v24, %v199_v22  ;;  %v201_v28 = vld [vmem:[%s802_s4 + $0x30] sm:$0xff]  ;;  %v202_v30 = vld [vmem:[%s802_s4 + $0x38] sm:$0xff] }
   0x8   :  { %v565_v29 = vpack.c.bf16 %v184_v26, %v183_v25  ;;  %v185_v31 = vld [vmem:[%s801_s3 + $0x30] sm:$0xff]  ;;  %v186_v32 = vld [vmem:[%s801_s3 + $0x38] sm:$0xff]  ;;  %v544_v33 = vpack.c.bf16 %v202_v30, %v201_v28  ;;  %v203_v34 = vld [vmem:[%s802_s4 + $0x40] sm:$0xff] }
   0x9   :  { %v568_v35 = vpack.c.bf16 %v186_v32, %v185_v31  ;;  %v204_v36 = vld [vmem:[%s802_s4 + $0x48] sm:$0xff]  ;;  %v187_v37 = vld [vmem:[%s801_s3 + $0x40] sm:$0xff]  ;;  %v205_v40 = vld [vmem:[%s802_s4 + $0x50] sm:$0xff] }
   0xa   :  { %v188_v38 = vld [vmem:[%s801_s3 + $0x48] sm:$0xff]  ;;  %v547_v39 = vpack.c.bf16 %v204_v36, %v203_v34  ;;  %v206_v42 = vld [vmem:[%s802_s4 + $0x58] sm:$0xff]  ;;  %v189_v43 = vld [vmem:[%s801_s3 + $0x50] sm:$0xff] }
   0xb   :  { %v571_v41 = vpack.c.bf16 %v188_v38, %v187_v37  ;;  %v190_v44 = vld [vmem:[%s801_s3 + $0x58] sm:$0xff]  ;;  %v550_v45 = vpack.c.bf16 %v206_v42, %v205_v40  ;;  %v207_v47 = vld [vmem:[%s802_s4 + $0x60] sm:$0xff]  ;;  %v208_v48 = vld [vmem:[%s802_s4 + $0x68] sm:$0xff] }
   0xc   :  { %v574_v46 = vpack.c.bf16 %v190_v44, %v189_v43  ;;  %v553_v49 = vpack.c.bf16 %v208_v48, %v207_v47  ;;  %v209_v50 = vld [vmem:[%s802_s4 + $0x70] sm:$0xff]  ;;  %v210_v51 = vld [vmem:[%s802_s4 + $0x78] sm:$0xff]  ;;  %v191_v53 = vld [vmem:[%s801_s3 + $0x60] sm:$0xff] }
   0xd   :  { %v556_v52 = vpack.c.bf16 %v210_v51, %v209_v50  ;;  %v192_v54 = vld [vmem:[%s801_s3 + $0x68] sm:$0xff]  ;;  %v193_v56 = vld [vmem:[%s801_s3 + $0x70] sm:$0xff]  ;;  %v194_v57 = vld [vmem:[%s801_s3 + $0x78] sm:$0xff] }
   0xe   :  { %v577_v55 = vpack.c.bf16 %v192_v54, %v191_v53  ;;  %v580_v58 = vpack.c.bf16 %v194_v57, %v193_v56  ;;  %v21_v59 = vld [vmem:[%s799_s1] sm:$0xff]  ;;  %s621_s1 = smov [#allocation2]  }
   0xf   :  { %s412_s3 = sshll.u32 %s621_s1, 4  ;;  %s413_s3 = int_to_ptr.vmem [resolvable:$true] %s412_s3 }
  0x10   :  { %s593_s10 = scalar_lea.vmem %s413_s3, 16  ;;  %s597_s11 = scalar_lea.vmem %s413_s3, 32 }
  0x11   :  { %p594_p0 = scmp.ne.s32.totalorder %s413_s3, %s593_s10  ;;  %p598_p1 = scmp.lt.s32.totalorder %s413_s3, %s413_s3 }
  0x12   :  { %p599_p2 = scmp.lt.s32.totalorder %s597_s11, %s593_s10 }
  0x14   :  { %p600_p3 = por %p599_p2, %p598_p1 }
  0x16   :  { %p601_p4 = pnand %p600_p3, %p594_p0 }
  0x83   :  { %v30_v13 = vpop.permute.xlu0 %29 }
  0x84   :  { %vm31_vm2 = vcmp.eq.s32.totalorder %v27_v9, %v30_v13 }
  0x85   :  { %v420_v20 = vsel %vm31_vm2, 1.0, %v618_v3 }
  0x86   :  { %421 = vmatmul.mubr.msk.f32.vlgmr.msra.gmra.mrb[0].mxu0 %vm34_vm1, %v420_v20  ;;  %462 = vmatmul.mubr.msk.f32.vlgmr.msra.gmra.mrb[0].mxu1 %vm34_vm1, %v420_v20 }
  0x87   :  { %536 = vmatpush3.bf16.msra.mxu1 %v535_v14  ;;  %560 = vmatpush3.bf16.msra.mxu0 %v559_v16 }
  0x88   :  { %537 = vmatprep.subr.bf16.mxu1 %v620_v6  ;;  %561 = vmatprep.subr.bf16.mxu0 %v620_v6 }
  0x89   :  { %496 = vmatprep.mubr.msk.f32.mxu1 %vm619_vm0, %v618_v3  ;;  %531 = vmatprep.mubr.msk.f32.mxu0 %vm619_vm0, %v618_v3 }
  0x8b   :  { %539 = vmatpush3.bf16.msra.mxu1 %v538_v21  ;;  %563 = vmatpush3.bf16.msra.mxu0 %v562_v23 }
  0x8c   :  { %540 = vmatprep.subr.bf16.mxu1 %v620_v6  ;;  %564 = vmatprep.subr.bf16.mxu0 %v620_v6 }
  0x8f   :  { %542 = vmatpush3.bf16.msra.mxu1 %v541_v27  ;;  %566 = vmatpush3.bf16.msra.mxu0 %v565_v29 }
  0x90   :  { %543 = vmatprep.subr.bf16.mxu1 %v620_v6  ;;  %567 = vmatprep.subr.bf16.mxu0 %v620_v6 }
  0x93   :  { %545 = vmatpush3.bf16.msra.mxu1 %v544_v33  ;;  %569 = vmatpush3.bf16.msra.mxu0 %v568_v35 }
  0x94   :  { %546 = vmatprep.subr.bf16.mxu1 %v620_v6  ;;  %570 = vmatprep.subr.bf16.mxu0 %v620_v6 }
  0x97   :  { %548 = vmatpush3.bf16.msra.mxu1 %v547_v39  ;;  %572 = vmatpush3.bf16.msra.mxu0 %v571_v41 }
  0x98   :  { %549 = vmatprep.subr.bf16.mxu1 %v620_v6  ;;  %573 = vmatprep.subr.bf16.mxu0 %v620_v6 }
  0x9b   :  { %551 = vmatpush3.bf16.msra.mxu1 %v550_v45  ;;  %575 = vmatpush3.bf16.msra.mxu0 %v574_v46 }
  0x9c   :  { %552 = vmatprep.subr.bf16.mxu1 %v620_v6  ;;  %576 = vmatprep.subr.bf16.mxu0 %v620_v6 }
  0x9f   :  { %554 = vmatpush3.bf16.msra.mxu1 %v553_v49  ;;  %578 = vmatpush3.bf16.msra.mxu0 %v577_v55 }
  0xa0   :  { %555 = vmatprep.subr.bf16.mxu1 %v620_v6  ;;  %579 = vmatprep.subr.bf16.mxu0 %v620_v6 }
  0xa3   :  { %557 = vmatpush3.bf16.msra.mxu1 %v556_v52  ;;  %581 = vmatpush3.bf16.msra.mxu0 %v580_v58 }
 0x159   :  { %v104_v60 = vpop.f32.mrb[0].mxu0  ;;  %v175_v61 = vpop.f32.mrb[0].mxu1 }
 0x15a   :  { %v106_v62 = vpop.f32.mrb[1].mxu0  ;;  %v463_v63 = vpop.f32.mrb[1].mxu1  ;;  %v354_v0 = vmul.f32 %v104_v60, %v21_v59 }
 0x15b   :  { %v211_v1 = vmul.f32 %v106_v62, %v104_v60  ;;  %497 = vmatmul.mubr.f32.vlgmr.msra.gmra.mrb[2].mxu1 %v106_v62 }
 0x15d   :  { %v212_v2 = vmul.f32 0.1, %v211_v1 }
 0x15f   :  { %v213_v3 = vsub.f32 %v21_v59, %v212_v2 }
 0x161   :  { %532 = vmatmul.mubr.f32.vlgmr.msra.gmra.mrb[2].mxu0 %v213_v3 }
 0x22e   :  { %v280_v4 = vpop.f32.mrb[2].mxu1 }
 0x22f   :  { %v498_v5 = vpop.f32.mrb[3].mxu1 }
 0x234   :  { %v350_v6 = vpop.f32.mrb[2].mxu0 }
 0x235   :  { %v351_v7 = vadd.f32 %v350_v6, %v280_v4  ;;  %v533_v8 = vpop.f32.mrb[3].mxu0 }
 0x237   :  { %v358_v9 = vsel %vm34_vm1, %v351_v7, -inf }
 0x238   :  { %359 = vmax.xlane.f32.xlu0 %v358_v9 }
 0x2c5   :  { %v360_v10 = vpop.xlane.xlu0 %359 }
 0x2c6   :  { %v361_v11 = vsub.f32 %v351_v7, %v360_v10 }
 0x2c8   :  { %v362_v12 = vmul.f32 1.442695, %v361_v11 }
 0x2ca   :  { %589 = vpow2.f32 %v362_v12 }
 0x2d4   :  { %v590_v13 = vpop.eup %589 }
 0x2d5   :  { %v364_v14 = vsel %vm34_vm1, %v590_v13, 0.0 }
 0x2d6   :  { %365 = vadd.xlane.f32.xlu1 %v364_v14 }
 0x2da   :  { %355 = vadd.xlane.f32.xlu1 %v354_v0 }
 0x363   :  { %v366_v15 = vpop.xlane.xlu1 %365 }
 0x364   :  { %v367_v16 = vadd.f32 1e-06, %v366_v15 }
 0x366   :  { %591 = vlog2.f32 %v367_v16 }
 0x367   :  { %v356_v18 = vpop.xlane.xlu1 %355 }
 0x368   :  { %v357_v20 = vsub.f32 %v175_v61, %v356_v18 }
 0x370   :  { %v592_v17 = vpop.eup %591 }
 0x371   :  { %v369_v19 = vmul.f32 0.6931472, %v592_v17 }
 0x373   :  { %v370_v21 = vadd.f32 %v369_v19, %v360_v10 }
 0x375   :  { %v371_v22 = vadd.f32 %v370_v21, %v357_v20 }
 0x377   :  { %372 = vxpose.xlu1.b32.start.end [1/1] (short) (narrow) %v371_v22, 8 }
 0x3f7   :  { %v388_v23 = vpop.trf.xlu1 }
 0x3f8   :  { %405 = vst.msk [vmem:[#allocation2] sm:$0x1] %vm404_vm3, %v388_v23 }
 0x3f9   :  { %604 = shalt.err (!%p601_p4)
}
 0x3fa   :  { %s605_s14 = scalar_lea.hbm %s803_s5, 16 }
 0x3fb   :  { %p606_p5 = scmp.ne.s32.totalorder %s803_s5, %s605_s14  ;;  %p609_p6 = scmp.lt.u32.totalorder %s605_s14, %s803_s5 }
 0x3fd   :  { %p611_p7 = pnand %p609_p6, %p606_p5 }
 0x3ff   :  { %614 = shalt.err (!%p611_p7)
}
 0x400   :  { %415 = dma.vmem_to_hbm [thread:$0]  %s413_s3, 16, %s803_s5, [#allocation3]  }
 0x401   :  { %615 = dma.done.wait [#allocation3], 16  }
 0x402   :  { %616 = vsyncadd [#allocation3], 4294967280 }
 0x403   :  { %419 = vsyncpa [#allocation3], 1 }

</bundles_post_ra>
